<compile_context>
chip_gen: v7x
topology: tpu7x:2x2x1
jax: 0.10.0
libtpu: 0.0.40
codegen_flags: <defaults>
</compile_context>

<pallas_src>
import numpy as np
import jax
import jax.numpy as jnp
from jax.experimental import pallas as pl
from jax.experimental.pallas import tpu as pltpu

N_QUBITS = 4
Q_DEPTH = 6
Q_DELTA = 0.01
DIM = 2 ** N_QUBITS          # 16
IN_FEATURES = 512
OUT_FEATURES = 5


# ----------------------------------------------------------------------------
# Constant circuit matrices (glue, plain numpy)
# ----------------------------------------------------------------------------
def _bitpos(wire):
    # wire 0 is the most significant bit of the basis-state index
    return N_QUBITS - 1 - wire


def build_ry_flip_mats():
    """D_q such that RY(t) on wire q is: cos(t/2)*s + sin(t/2)*(s @ D_q)."""
    mats = np.zeros((N_QUBITS, DIM, DIM), np.float32)
    for q in range(N_QUBITS):
        bp = _bitpos(q)
        for i in range(DIM):
            j = i ^ (1 << bp)                       # partner index (bit q flipped)
            sgn = 1.0 if ((i >> bp) & 1) else -1.0  # a0' = c a0 - s a1 ; a1' = s a0 + c a1
            mats[q, j, i] = sgn
    return mats


def build_entangler():
    """Composite CNOT(0,1); CNOT(2,3); CNOT(1,2) in row-vector (state @ G) form.

    This is exactly entangling_layer(4) from the spec:
      for i in range(0,3,2): CNOT(i,i+1)   -> CNOT(0,1), CNOT(2,3)
      for i in range(1,3,2): CNOT(i,i+1)   -> CNOT(1,2)
    """
    def cnot(c, t):
        P = np.zeros((DIM, DIM), np.float32)
        bc, bt = _bitpos(c), _bitpos(t)
        for i in range(DIM):
            j = i ^ (1 << bt) if ((i >> bc) & 1) else i
            P[j, i] = 1.0
        return P
    return cnot(0, 1) @ cnot(2, 3) @ cnot(1, 2)


def build_zmat():
    """Z[i, p] = <i|Z_p|i>; expvals = probs @ Z."""
    Z = np.zeros((DIM, N_QUBITS), np.float32)
    for p in range(N_QUBITS):
        bp = _bitpos(p)
        for i in range(DIM):
            Z[i, p] = -1.0 if ((i >> bp) & 1) else 1.0
    return Z


def build_sign_mat():
    """SGN[q, i] = +1 if wire-q bit of basis index i is 1 else -1.

    After H + RY(t_q) the state is a product state:
      amp(i) = (1/4) * prod_q (cos(t_q/2) + SGN[q,i] * sin(t_q/2))
    """
    S = np.zeros((N_QUBITS, DIM), np.float32)
    for q in range(N_QUBITS):
        bp = _bitpos(q)
        for i in range(DIM):
            S[q, i] = 1.0 if ((i >> bp) & 1) else -1.0
    return S


D_MATS = jnp.asarray(build_ry_flip_mats())   # (4, 16, 16)
G_ENT = jnp.asarray(build_entangler())       # (16, 16)
Z_MAT = jnp.asarray(build_zmat())            # (16, 4)
SGN_MAT = jnp.asarray(build_sign_mat())      # (4, 16)


# ----------------------------------------------------------------------------
# Per-call constant folding (exact algebra on 16x16 matrices, done in wrapper)
# ----------------------------------------------------------------------------
def _fold_depth_layers(q_params):
    """Fold the q_depth (entangler + trainable-RY) layers into one 16x16 matrix.

    Row-vector form: state_out = state_in @ M with
      M = prod_k [ G_ENT @ prod_q (cos(w_kq/2) I + sin(w_kq/2) D_q) ]
    Exact because the trainable angles are per-call constants (not per-sample).
    """
    half = q_params.astype(jnp.float32) * 0.5          # (6, 4)
    c = jnp.cos(half)
    s = jnp.sin(half)
    eye = jnp.eye(DIM, dtype=jnp.float32)
    M = eye
    for k in range(Q_DEPTH):
        layer = G_ENT
        for q in range(N_QUBITS):
            layer = layer @ (c[k, q] * eye + s[k, q] * D_MATS[q])
        M = M @ layer
    return M                                            # (16, 16)


# ----------------------------------------------------------------------------
# Pallas kernel: per batch tile -> pre_net + folded circuit + folded post_net
# ----------------------------------------------------------------------------
def _dressed_qnet_kernel(x_ref, w_pre_ref, b_pre_ref, sgn_ref, m_ref,
                         zw_ref, b_post_ref, out_ref):
    x = x_ref[...]                                                  # (BT, 512)

    # pre_net: Linear(512 -> 4)
    pre = jnp.dot(x, w_pre_ref[...],
                  preferred_element_type=jnp.float32) + b_pre_ref[...]   # (BT, 4)

    # q_in = tanh(pre) * pi/2 ; RY uses half-angles => pi/4 factor
    half_in = jnp.tanh(pre) * (jnp.pi / 4.0)                        # (BT, 4)
    c = jnp.cos(half_in)
    s = jnp.sin(half_in)

    # H layer + input RY layer in closed form (separable product state):
    #   amp(i) = 0.25 * prod_q (c_q + SGN[q,i] * s_q)   -- 4 VPU passes, no matmul
    sgn = sgn_ref[...]                                              # (4, 16)
    state = jnp.full((x.shape[0], DIM), 0.25, dtype=jnp.float32)    # (BT, 16)
    for q in range(N_QUBITS):
        state = state * (c[:, q:q + 1] + s[:, q:q + 1] * sgn[q:q + 1, :])

    # all q_depth (entangler + trainable RY) layers folded into one 16x16 matmul
    state = jnp.dot(state, m_ref[...],
                    preferred_element_type=jnp.float32)             # (BT, 16)

    # <Z_p> expvals folded with post_net: out = (state^2) @ (Z @ W_post) + b_post
    probs = state * state
    out_ref[...] = jnp.dot(probs, zw_ref[...],
                           preferred_element_type=jnp.float32) + b_post_ref[...]


def _round_up(n, m):
    return (n + m - 1) // m * m


def dressed_quantum_net(x, params, b_tile=1024):
    B = x.shape[0]
    bt = min(b_tile, _round_up(max(B, 1), 8))       # batch tile, multiple of 8
    B_pad = _round_up(B, bt)
    if B_pad != B:
        x = jnp.pad(x, ((0, B_pad - B), (0, 0)))    # padded rows sliced off below

    # per-call constant folding (trainable angles & Z/post_net), hoisted out of
    # the grid so per-step work stays mem-bound on x
    circuit_mat = _fold_depth_layers(params["q_params"])            # (16, 16)
    zw_post = Z_MAT @ params["w_post"]                              # (16, 5)

    def const_spec(shape):
        return pl.BlockSpec(shape, lambda i: (0, 0))

    out = pl.pallas_call(
        _dressed_qnet_kernel,
        out_shape=jax.ShapeDtypeStruct((B_pad, OUT_FEATURES), jnp.float32),
        grid=(B_pad // bt,),
        in_specs=[
            pl.BlockSpec((bt, IN_FEATURES), lambda i: (i, 0)),      # x (tiled)
            const_spec((IN_FEATURES, N_QUBITS)),                    # W_pre
            const_spec((1, N_QUBITS)),                              # b_pre
            const_spec((N_QUBITS, DIM)),                            # SGN
            const_spec((DIM, DIM)),                                 # folded circuit
            const_spec((DIM, OUT_FEATURES)),                        # Z @ W_post
            const_spec((1, OUT_FEATURES)),                          # b_post
        ],
        out_specs=pl.BlockSpec((bt, OUT_FEATURES), lambda i: (i, 0)),
        compiler_params=pltpu.CompilerParams(
            dimension_semantics=("parallel",),        # megacore / v7x 2-TC shard
            vmem_limit_bytes=32 * 1024 * 1024,        # 2 MiB x-tile, 2x buffered
        ),
    )(x, params["w_pre"], params["b_pre"], SGN_MAT, circuit_mat,
      zw_post, params["b_post"])
    return out[:B]


# ----------------------------------------------------------------------------
# Pure-JAX reference (unfolded statevector simulation) for correctness check
# ----------------------------------------------------------------------------
def dressed_quantum_net_ref(x, params):
    pre = x @ params["w_pre"] + params["b_pre"]
    half_in = jnp.tanh(pre) * (jnp.pi / 4.0)
    c_in, s_in = jnp.cos(half_in), jnp.sin(half_in)
    half_w = params["q_params"] * 0.5
    c_w, s_w = jnp.cos(half_w), jnp.sin(half_w)
    state = jnp.full((x.shape[0], DIM), 0.25, jnp.float32)
    for q in range(N_QUBITS):
        state = c_in[:, q:q + 1] * state + s_in[:, q:q + 1] * (state @ D_MATS[q])
    for k in range(Q_DEPTH):
        state = state @ G_ENT
        for q in range(N_QUBITS):
            state = c_w[k, q] * state + s_w[k, q] * (state @ D_MATS[q])
    q_out = (state * state) @ Z_MAT
    return q_out @ params["w_post"] + params["b_post"]


# ----------------------------------------------------------------------------
# Deterministic parameter init (matches nn.Linear default init + q_delta*randn)
# ----------------------------------------------------------------------------
def init_params(key):
    k1, k2, k3, k4, k5 = jax.random.split(key, 5)
    bound_pre = 1.0 / np.sqrt(IN_FEATURES)
    bound_post = 1.0 / np.sqrt(N_QUBITS)
    return {
        "w_pre": jax.random.uniform(k1, (IN_FEATURES, N_QUBITS), jnp.float32,
                                    -bound_pre, bound_pre),
        "b_pre": jax.random.uniform(k2, (1, N_QUBITS), jnp.float32,
                                    -bound_pre, bound_pre),
        "q_params": (Q_DELTA * jax.random.normal(k3, (Q_DEPTH * N_QUBITS,),
                                                 jnp.float32)
                     ).reshape(Q_DEPTH, N_QUBITS),
        "w_post": jax.random.uniform(k4, (N_QUBITS, OUT_FEATURES), jnp.float32,
                                     -bound_post, bound_post),
        "b_post": jax.random.uniform(k5, (1, OUT_FEATURES), jnp.float32,
                                     -bound_post, bound_post),
    }


if __name__ == "__main__":
    key = jax.random.PRNGKey(0)
    kx, kp = jax.random.split(key)
    batch = 2
    x = jax.random.normal(kx, (batch, IN_FEATURES), jnp.float32)   # (2, 512)
    params = init_params(kp)

    out = dressed_quantum_net(x, params)
    out = jax.block_until_ready(out)
    assert out.shape == (batch, OUT_FEATURES)
    assert jnp.all(jnp.isfinite(out))

    ref = dressed_quantum_net_ref(x, params)
    assert jnp.allclose(out, ref, atol=1e-4, rtol=1e-4)
    print("KERNEL_OK")
</pallas_src>

<mosaic_0001>
module attributes {stable_mosaic.version = 11 : i64} {
  func.func @_dressed_qnet_kernel(%arg0: i32, %arg1: memref<8x512xf32, #tpu.memory_space<vmem>>, %arg2: memref<512x4xf32, #tpu.memory_space<vmem>>, %arg3: memref<1x4xf32, #tpu.memory_space<vmem>>, %arg4: memref<4x16xf32, #tpu.memory_space<vmem>>, %arg5: memref<16x16xf32, #tpu.memory_space<vmem>>, %arg6: memref<16x5xf32, #tpu.memory_space<vmem>>, %arg7: memref<1x5xf32, #tpu.memory_space<vmem>>, %arg8: memref<8x5xf32, #tpu.memory_space<vmem>>) attributes {dimension_semantics = [#tpu.dimension_semantics<parallel>], iteration_bounds = array<i64: 1>, scalar_prefetch = 0 : i64, scratch_operands = 0 : i64, tpu.core_type = #tpu.core_type<tc>, window_params = [{transform_indices = @transform_0, window_bounds = array<i64: 8, 512>}, {pipeline_mode = #tpu.pipeline_mode<synchronous>, transform_indices = @transform_1, window_bounds = array<i64: 512, 4>}, {pipeline_mode = #tpu.pipeline_mode<synchronous>, transform_indices = @transform_2, window_bounds = array<i64: 1, 4>}, {pipeline_mode = #tpu.pipeline_mode<synchronous>, transform_indices = @transform_3, window_bounds = array<i64: 4, 16>}, {pipeline_mode = #tpu.pipeline_mode<synchronous>, transform_indices = @transform_4, window_bounds = array<i64: 16, 16>}, {pipeline_mode = #tpu.pipeline_mode<synchronous>, transform_indices = @transform_5, window_bounds = array<i64: 16, 5>}, {pipeline_mode = #tpu.pipeline_mode<synchronous>, transform_indices = @transform_6, window_bounds = array<i64: 1, 5>}, {transform_indices = @transform_7, window_bounds = array<i64: 8, 5>}]} {
    %c0 = arith.constant 0 : index
    %c0_0 = arith.constant 0 : index
    %0 = vector.load %arg1[%c0, %c0_0] : memref<8x512xf32, #tpu.memory_space<vmem>>, vector<8x512xf32>
    %c0_1 = arith.constant 0 : index
    %c0_2 = arith.constant 0 : index
    %1 = vector.load %arg2[%c0_1, %c0_2] : memref<512x4xf32, #tpu.memory_space<vmem>>, vector<512x4xf32>
    %cst = arith.constant dense<0.000000e+00> : vector<8x4xf32>
    %2 = tpu.matmul %0, %1, %cst {dimension_numbers = #tpu.dot_dimension_numbers<[1], [0], [0], [1], [0, 0, 1, 1], [], []>} : vector<8x512xf32>, vector<512x4xf32>, vector<8x4xf32> -> vector<8x4xf32>
    %c0_3 = arith.constant 0 : index
    %c0_4 = arith.constant 0 : index
    %3 = vector.load %arg3[%c0_3, %c0_4] : memref<1x4xf32, #tpu.memory_space<vmem>>, vector<1x4xf32>
    %4 = vector.broadcast %3 : vector<1x4xf32> to vector<8x4xf32>
    %5 = arith.addf %2, %4 : vector<8x4xf32>
    %6 = math.tanh %5 : vector<8x4xf32>
    %cst_5 = arith.constant 0.785398185 : f32
    %7 = vector.broadcast %cst_5 : f32 to vector<8x4xf32>
    %8 = arith.mulf %6, %7 : vector<8x4xf32>
    %9 = math.cos %8 : vector<8x4xf32>
    %10 = math.sin %8 : vector<8x4xf32>
    %c0_6 = arith.constant 0 : index
    %c0_7 = arith.constant 0 : index
    %11 = vector.load %arg4[%c0_6, %c0_7] : memref<4x16xf32, #tpu.memory_space<vmem>>, vector<4x16xf32>
    %cst_8 = arith.constant 2.500000e-01 : f32
    %12 = vector.broadcast %cst_8 : f32 to vector<8x16xf32>
    %13 = vector.extract_strided_slice %9 {offsets = [0, 0], sizes = [8, 1], strides = [1, 1]} : vector<8x4xf32> to vector<8x1xf32>
    %14 = vector.extract_strided_slice %10 {offsets = [0, 0], sizes = [8, 1], strides = [1, 1]} : vector<8x4xf32> to vector<8x1xf32>
    %15 = vector.extract_strided_slice %11 {offsets = [0, 0], sizes = [1, 16], strides = [1, 1]} : vector<4x16xf32> to vector<1x16xf32>
    %16 = vector.broadcast %14 : vector<8x1xf32> to vector<8x16xf32>
    %17 = vector.broadcast %15 : vector<1x16xf32> to vector<8x16xf32>
    %18 = arith.mulf %16, %17 : vector<8x16xf32>
    %19 = vector.broadcast %13 : vector<8x1xf32> to vector<8x16xf32>
    %20 = arith.addf %19, %18 : vector<8x16xf32>
    %21 = arith.mulf %12, %20 : vector<8x16xf32>
    %22 = vector.extract_strided_slice %9 {offsets = [0, 1], sizes = [8, 1], strides = [1, 1]} : vector<8x4xf32> to vector<8x1xf32>
    %23 = vector.extract_strided_slice %10 {offsets = [0, 1], sizes = [8, 1], strides = [1, 1]} : vector<8x4xf32> to vector<8x1xf32>
    %24 = vector.extract_strided_slice %11 {offsets = [1, 0], sizes = [1, 16], strides = [1, 1]} : vector<4x16xf32> to vector<1x16xf32>
    %25 = vector.broadcast %23 : vector<8x1xf32> to vector<8x16xf32>
    %26 = vector.broadcast %24 : vector<1x16xf32> to vector<8x16xf32>
    %27 = arith.mulf %25, %26 : vector<8x16xf32>
    %28 = vector.broadcast %22 : vector<8x1xf32> to vector<8x16xf32>
    %29 = arith.addf %28, %27 : vector<8x16xf32>
    %30 = arith.mulf %21, %29 : vector<8x16xf32>
    %31 = vector.extract_strided_slice %9 {offsets = [0, 2], sizes = [8, 1], strides = [1, 1]} : vector<8x4xf32> to vector<8x1xf32>
    %32 = vector.extract_strided_slice %10 {offsets = [0, 2], sizes = [8, 1], strides = [1, 1]} : vector<8x4xf32> to vector<8x1xf32>
    %33 = vector.extract_strided_slice %11 {offsets = [2, 0], sizes = [1, 16], strides = [1, 1]} : vector<4x16xf32> to vector<1x16xf32>
    %34 = vector.broadcast %32 : vector<8x1xf32> to vector<8x16xf32>
    %35 = vector.broadcast %33 : vector<1x16xf32> to vector<8x16xf32>
    %36 = arith.mulf %34, %35 : vector<8x16xf32>
    %37 = vector.broadcast %31 : vector<8x1xf32> to vector<8x16xf32>
    %38 = arith.addf %37, %36 : vector<8x16xf32>
    %39 = arith.mulf %30, %38 : vector<8x16xf32>
    %40 = vector.extract_strided_slice %9 {offsets = [0, 3], sizes = [8, 1], strides = [1, 1]} : vector<8x4xf32> to vector<8x1xf32>
    %41 = vector.extract_strided_slice %10 {offsets = [0, 3], sizes = [8, 1], strides = [1, 1]} : vector<8x4xf32> to vector<8x1xf32>
    %42 = vector.extract_strided_slice %11 {offsets = [3, 0], sizes = [1, 16], strides = [1, 1]} : vector<4x16xf32> to vector<1x16xf32>
    %43 = vector.broadcast %41 : vector<8x1xf32> to vector<8x16xf32>
    %44 = vector.broadcast %42 : vector<1x16xf32> to vector<8x16xf32>
    %45 = arith.mulf %43, %44 : vector<8x16xf32>
    %46 = vector.broadcast %40 : vector<8x1xf32> to vector<8x16xf32>
    %47 = arith.addf %46, %45 : vector<8x16xf32>
    %48 = arith.mulf %39, %47 : vector<8x16xf32>
    %c0_9 = arith.constant 0 : index
    %c0_10 = arith.constant 0 : index
    %49 = vector.load %arg5[%c0_9, %c0_10] : memref<16x16xf32, #tpu.memory_space<vmem>>, vector<16x16xf32>
    %cst_11 = arith.constant dense<0.000000e+00> : vector<8x16xf32>
    %50 = tpu.matmul %48, %49, %cst_11 {dimension_numbers = #tpu.dot_dimension_numbers<[1], [0], [0], [1], [0, 0, 1, 1], [], []>} : vector<8x16xf32>, vector<16x16xf32>, vector<8x16xf32> -> vector<8x16xf32>
    %51 = arith.mulf %50, %50 : vector<8x16xf32>
    %c0_12 = arith.constant 0 : index
    %c0_13 = arith.constant 0 : index
    %52 = vector.load %arg6[%c0_12, %c0_13] : memref<16x5xf32, #tpu.memory_space<vmem>>, vector<16x5xf32>
    %cst_14 = arith.constant dense<0.000000e+00> : vector<8x5xf32>
    %53 = tpu.matmul %51, %52, %cst_14 {dimension_numbers = #tpu.dot_dimension_numbers<[1], [0], [0], [1], [0, 0, 1, 1], [], []>} : vector<8x16xf32>, vector<16x5xf32>, vector<8x5xf32> -> vector<8x5xf32>
    %c0_15 = arith.constant 0 : index
    %c0_16 = arith.constant 0 : index
    %54 = vector.load %arg7[%c0_15, %c0_16] : memref<1x5xf32, #tpu.memory_space<vmem>>, vector<1x5xf32>
    %55 = vector.broadcast %54 : vector<1x5xf32> to vector<8x5xf32>
    %56 = arith.addf %53, %55 : vector<8x5xf32>
    %c0_17 = arith.constant 0 : index
    %c0_18 = arith.constant 0 : index
    %57 = vector.load %arg8[%c0_17, %c0_18] : memref<8x5xf32, #tpu.memory_space<vmem>>, vector<8x5xf32>
    tpu.vector_store %arg8[%c0_17, %c0_18], %56 {strides = array<i32>} : memref<8x5xf32, #tpu.memory_space<vmem>>, vector<8x5xf32>,
    return
  }
  func.func @transform_0(%arg0: i32) -> (i32, i32) {
    %c0_i32 = arith.constant 0 : i32
    %c0_i32_0 = arith.constant 0 : i32
    return %arg0, %c0_i32 : i32, i32
  }
  func.func @transform_1(%arg0: i32) -> (i32, i32) {
    %c0_i32 = arith.constant 0 : i32
    %c0_i32_0 = arith.constant 0 : i32
    %c0_i32_1 = arith.constant 0 : i32
    return %c0_i32, %c0_i32_0 : i32, i32
  }
  func.func @transform_2(%arg0: i32) -> (i32, i32) {
    %c0_i32 = arith.constant 0 : i32
    %c0_i32_0 = arith.constant 0 : i32
    %c0_i32_1 = arith.constant 0 : i32
    return %c0_i32, %c0_i32_0 : i32, i32
  }
  func.func @transform_3(%arg0: i32) -> (i32, i32) {
    %c0_i32 = arith.constant 0 : i32
    %c0_i32_0 = arith.constant 0 : i32
    %c0_i32_1 = arith.constant 0 : i32
    return %c0_i32, %c0_i32_0 : i32, i32
  }
  func.func @transform_4(%arg0: i32) -> (i32, i32) {
    %c0_i32 = arith.constant 0 : i32
    %c0_i32_0 = arith.constant 0 : i32
    %c0_i32_1 = arith.constant 0 : i32
    return %c0_i32, %c0_i32_0 : i32, i32
  }
  func.func @transform_5(%arg0: i32) -> (i32, i32) {
    %c0_i32 = arith.constant 0 : i32
    %c0_i32_0 = arith.constant 0 : i32
    %c0_i32_1 = arith.constant 0 : i32
    return %c0_i32, %c0_i32_0 : i32, i32
  }
  func.func @transform_6(%arg0: i32) -> (i32, i32) {
    %c0_i32 = arith.constant 0 : i32
    %c0_i32_0 = arith.constant 0 : i32
    %c0_i32_1 = arith.constant 0 : i32
    return %c0_i32, %c0_i32_0 : i32, i32
  }
  func.func @transform_7(%arg0: i32) -> (i32, i32) {
    %c0_i32 = arith.constant 0 : i32
    %c0_i32_0 = arith.constant 0 : i32
    return %arg0, %c0_i32 : i32, i32
  }
}

</mosaic_0001>

<bundles_post_ra>
// kernel: tpu_custom_call.1
= control target key start
LH: loop header
LB: loop body
LE: loop exit
PB: predicated region body
PF: predicated region fallthrough
CT: control target
= control target key end

     0   :  { %s1227_s0 = inlined_call_operand.vmem [shape: f32[8,512], index: 0, kind: input, shape index: {}]   ;;  %s1228_s1 = inlined_call_operand.vmem [shape: f32[512,4], index: 1, kind: input, shape index: {}]   ;;  %s1229_s2 = inlined_call_operand.vmem [shape: f32[1,4], index: 2, kind: input, shape index: {}]   ;;  %s1230_s3 = inlined_call_operand.vmem [shape: f32[4,16], index: 3, kind: input, shape index: {}]   ;;  %s1231_s4 = inlined_call_operand.vmem [shape: f32[16,16], index: 4, kind: input, shape index: {}]   ;;  %s1232_s5 = inlined_call_operand.vmem [shape: f32[16,5], index: 5, kind: input, shape index: {}]   ;;  %s1233_s6 = inlined_call_operand.vmem [shape: f32[1,5], index: 6, kind: input, shape index: {}]   ;;  %s1234_s7 = inlined_call_operand.hbm [shape: f32[8,5], index: 7, kind: output, shape index: {}]  }
   0x1   :  { %v47_v0 = vld [vmem:[%s1228_s1 + $0x80] sm:$0xff]  ;;  %v48_v1 = vld [vmem:[%s1228_s1 + $0x88] sm:$0xff]  ;;  %v49_v11 = vld [vmem:[%s1228_s1 + $0x90] sm:$0xff] }
   0x2   :  { %v31_v2 = vld [vmem:[%s1228_s1] sm:$0xff]  ;;  %v791_v3 = vpack.c.bf16 %v48_v1, %v47_v0  ;;  %v32_v4 = vld [vmem:[%s1228_s1 + $0x8] sm:$0xff]  ;;  %v50_v13 = vld [vmem:[%s1228_s1 + $0x98] sm:$0xff] }
   0x3   :  { %v79_v5 = vld [vmem:[%s1228_s1 + $0x180] sm:$0xff]  ;;  %v80_v6 = vld [vmem:[%s1228_s1 + $0x188] sm:$0xff]  ;;  %v793_v7 = vpack.c.bf16 %v32_v4, %v31_v2  ;;  %v33_v14 = vld [vmem:[%s1228_s1 + $0x10] sm:$0xff]  ;;  %v795_v16 = vpack.c.bf16 %v50_v13, %v49_v11 }
   0x4   :  { %v823_v8 = vpack.c.bf16 %v80_v6, %v79_v5  ;;  %v63_v9 = vld [vmem:[%s1228_s1 + $0x100] sm:$0xff]  ;;  %v64_v10 = vld [vmem:[%s1228_s1 + $0x108] sm:$0xff]  ;;  %792 = vmatprep.subr.bf16.mxu0 %v791_v3  ;;  %v34_v15 = vld [vmem:[%s1228_s1 + $0x18] sm:$0xff] }
   0x5   :  { %v825_v12 = vpack.c.bf16 %v64_v10, %v63_v9  ;;  %794 = vmatpush3.bf16.msra.mxu0 %v793_v7  ;;  %v797_v17 = vpack.c.bf16 %v34_v15, %v33_v14  ;;  %v81_v18 = vld [vmem:[%s1228_s1 + $0x190] sm:$0xff]  ;;  %v82_v19 = vld [vmem:[%s1228_s1 + $0x198] sm:$0xff]  ;;  %v51_v23 = vld [vmem:[%s1228_s1 + $0xa0] sm:$0xff] }
   0x6   :  { %824 = vmatprep.subr.bf16.mxu1 %v823_v8  ;;  %v65_v20 = vld [vmem:[%s1228_s1 + $0x110] sm:$0xff]  ;;  %v827_v21 = vpack.c.bf16 %v82_v19, %v81_v18  ;;  %v66_v22 = vld [vmem:[%s1228_s1 + $0x118] sm:$0xff]  ;;  %v52_v24 = vld [vmem:[%s1228_s1 + $0xa8] sm:$0xff]  ;;  %796 = vmatprep.subr.bf16.mxu0 %v795_v16 }
   0x7   :  { %826 = vmatpush3.bf16.msra.mxu1 %v825_v12  ;;  %v829_v25 = vpack.c.bf16 %v66_v22, %v65_v20  ;;  %v799_v26 = vpack.c.bf16 %v52_v24, %v51_v23  ;;  %v35_v27 = vld [vmem:[%s1228_s1 + $0x20] sm:$0xff]  ;;  %v36_v28 = vld [vmem:[%s1228_s1 + $0x28] sm:$0xff]  ;;  %v53_v35 = vld [vmem:[%s1228_s1 + $0xb0] sm:$0xff] }
   0x8   :  { %v83_v29 = vld [vmem:[%s1228_s1 + $0x1a0] sm:$0xff]  ;;  %828 = vmatprep.subr.bf16.mxu1 %v827_v21  ;;  %v84_v30 = vld [vmem:[%s1228_s1 + $0x1a8] sm:$0xff]  ;;  %v801_v33 = vpack.c.bf16 %v36_v28, %v35_v27  ;;  %v54_v36 = vld [vmem:[%s1228_s1 + $0xb8] sm:$0xff] }
   0x9   :  { %v67_v31 = vld [vmem:[%s1228_s1 + $0x120] sm:$0xff]  ;;  %v68_v32 = vld [vmem:[%s1228_s1 + $0x128] sm:$0xff]  ;;  %798 = vmatpush3.bf16.msra.mxu0 %v797_v17  ;;  %v831_v34 = vpack.c.bf16 %v84_v30, %v83_v29  ;;  %v37_v37 = vld [vmem:[%s1228_s1 + $0x30] sm:$0xff]  ;;  %v803_v39 = vpack.c.bf16 %v54_v36, %v53_v35 }
   0xa   :  { %800 = vmatprep.subr.bf16.mxu0 %v799_v26  ;;  %v833_v38 = vpack.c.bf16 %v68_v32, %v67_v31  ;;  %v38_v40 = vld [vmem:[%s1228_s1 + $0x38] sm:$0xff]  ;;  %v85_v41 = vld [vmem:[%s1228_s1 + $0x1b0] sm:$0xff]  ;;  %v55_v46 = vld [vmem:[%s1228_s1 + $0xc0] sm:$0xff] }
   0xb   :  { %830 = vmatpush3.bf16.msra.mxu1 %v829_v25  ;;  %v86_v42 = vld [vmem:[%s1228_s1 + $0x1b8] sm:$0xff]  ;;  %v69_v44 = vld [vmem:[%s1228_s1 + $0x130] sm:$0xff]  ;;  %v56_v47 = vld [vmem:[%s1228_s1 + $0xc8] sm:$0xff]  ;;  %v805_v48 = vpack.c.bf16 %v38_v40, %v37_v37 }
   0xc   :  { %832 = vmatprep.subr.bf16.mxu1 %v831_v34  ;;  %v835_v43 = vpack.c.bf16 %v86_v42, %v85_v41  ;;  %v70_v45 = vld [vmem:[%s1228_s1 + $0x138] sm:$0xff]  ;;  %v87_v49 = vld [vmem:[%s1228_s1 + $0x1c0] sm:$0xff]  ;;  %v88_v50 = vld [vmem:[%s1228_s1 + $0x1c8] sm:$0xff]  ;;  %v807_v52 = vpack.c.bf16 %v56_v47, %v55_v46 }
   0xd   :  { %802 = vmatpush3.bf16.msra.mxu0 %v801_v33  ;;  %v837_v51 = vpack.c.bf16 %v70_v45, %v69_v44  ;;  %v39_v53 = vld [vmem:[%s1228_s1 + $0x40] sm:$0xff]  ;;  %v40_v54 = vld [vmem:[%s1228_s1 + $0x48] sm:$0xff]  ;;  %v839_v56 = vpack.c.bf16 %v88_v50, %v87_v49  ;;  %v57_v58 = vld [vmem:[%s1228_s1 + $0xd0] sm:$0xff] }
   0xe   :  { %804 = vmatprep.subr.bf16.mxu0 %v803_v39  ;;  %v71_v55 = vld [vmem:[%s1228_s1 + $0x140] sm:$0xff]  ;;  %v72_v57 = vld [vmem:[%s1228_s1 + $0x148] sm:$0xff]  ;;  %v58_v59 = vld [vmem:[%s1228_s1 + $0xd8] sm:$0xff]  ;;  %v809_v62 = vpack.c.bf16 %v40_v54, %v39_v53 }
   0xf   :  { %834 = vmatpush3.bf16.msra.mxu1 %v833_v38  ;;  %v89_v60 = vld [vmem:[%s1228_s1 + $0x1d0] sm:$0xff]  ;;  %v90_v61 = vld [vmem:[%s1228_s1 + $0x1d8] sm:$0xff]  ;;  %v841_v63 = vpack.c.bf16 %v72_v57, %v71_v55  ;;  %v811_v0 = vpack.c.bf16 %v58_v59, %v57_v58  ;;  %v59_v6 = vld [vmem:[%s1228_s1 + $0xe0] sm:$0xff] }
  0x10   :  { %836 = vmatprep.subr.bf16.mxu1 %v835_v43  ;;  %v41_v1 = vld [vmem:[%s1228_s1 + $0x50] sm:$0xff]  ;;  %v42_v2 = vld [vmem:[%s1228_s1 + $0x58] sm:$0xff]  ;;  %v843_v4 = vpack.c.bf16 %v90_v61, %v89_v60  ;;  %v60_v7 = vld [vmem:[%s1228_s1 + $0xe8] sm:$0xff] }
  0x11   :  { %806 = vmatpush3.bf16.msra.mxu0 %v805_v48  ;;  %v73_v3 = vld [vmem:[%s1228_s1 + $0x150] sm:$0xff]  ;;  %v74_v5 = vld [vmem:[%s1228_s1 + $0x158] sm:$0xff]  ;;  %v91_v8 = vld [vmem:[%s1228_s1 + $0x1e0] sm:$0xff]  ;;  %v813_v10 = vpack.c.bf16 %v42_v2, %v41_v1  ;;  %v815_v15 = vpack.c.bf16 %v60_v7, %v59_v6 }
  0x12   :  { %808 = vmatprep.subr.bf16.mxu0 %v807_v52  ;;  %v92_v9 = vld [vmem:[%s1228_s1 + $0x1e8] sm:$0xff]  ;;  %v43_v11 = vld [vmem:[%s1228_s1 + $0x60] sm:$0xff]  ;;  %v845_v14 = vpack.c.bf16 %v74_v5, %v73_v3  ;;  %v61_v17 = vld [vmem:[%s1228_s1 + $0xf0] sm:$0xff] }
  0x13   :  { %838 = vmatpush3.bf16.msra.mxu1 %v837_v51  ;;  %v44_v12 = vld [vmem:[%s1228_s1 + $0x68] sm:$0xff]  ;;  %v75_v13 = vld [vmem:[%s1228_s1 + $0x160] sm:$0xff]  ;;  %v847_v19 = vpack.c.bf16 %v92_v9, %v91_v8  ;;  %v62_v20 = vld [vmem:[%s1228_s1 + $0xf8] sm:$0xff] }
  0x14   :  { %840 = vmatprep.subr.bf16.mxu1 %v839_v56  ;;  %v76_v16 = vld [vmem:[%s1228_s1 + $0x168] sm:$0xff]  ;;  %v30_v21 = vld [vmem:[%s1227_s0 + $0x18] sm:$0xff] }
  0x15   :  { %810 = vmatpush3.bf16.msra.mxu0 %v809_v62  ;;  %v28_v18 = vld [vmem:[%s1227_s0 + $0x8] sm:$0xff] }
  0x16   :  { %812 = vmatprep.subr.bf16.mxu0 %v811_v0  ;;  %166 = vmatprep.mubr.f32.mxu0 %v28_v18 }
  0x17   :  { %842 = vmatpush3.bf16.msra.mxu1 %v841_v63 }
  0x18   :  { %844 = vmatprep.subr.bf16.mxu1 %v843_v4 }
  0x19   :  { %12 = vsyncpa [#allocation3], 0  ;;  %v93_v22 = vld [vmem:[%s1228_s1 + $0x1f0] sm:$0xff]  ;;  %v94_v23 = vld [vmem:[%s1228_s1 + $0x1f8] sm:$0xff]  ;;  %236 = vmatprep.mubr.f32.mxu1 %v30_v21  ;;  %814 = vmatpush3.bf16.msra.mxu0 %v813_v10  ;;  %v817_v24 = vpack.c.bf16 %v44_v12, %v43_v11  ;;  %v849_v25 = vpack.c.bf16 %v76_v16, %v75_v13  ;;  %v819_v26 = vpack.c.bf16 %v62_v20, %v61_v17  ;;  %v915_v36 = vmov 1   ;;  %s928_s30 = smov [#allocation2]  }
  0x1a   :  { %816 = vmatprep.subr.bf16.mxu0 %v815_v15  ;;  %v45_v27 = vld [vmem:[%s1228_s1 + $0x70] sm:$0xff]  ;;  %v46_v28 = vld [vmem:[%s1228_s1 + $0x78] sm:$0xff]  ;;  %v851_v29 = vpack.c.bf16 %v94_v23, %v93_v22  ;;  %v27_v34 = vld [vmem:[%s1227_s0] sm:$0xff]  ;;  %880 = vset.pattern.permute.xlu1 %v915_v36  ;;  %v916_v37 = vmov 0   ;;  %v917_v59 = vmov 683565275  }
  0x1b   :  { %846 = vmatpush3.bf16.msra.mxu1 %v845_v14  ;;  %v77_v30 = vld [vmem:[%s1228_s1 + $0x170] sm:$0xff]  ;;  %v78_v31 = vld [vmem:[%s1228_s1 + $0x178] sm:$0xff]  ;;  %v821_v32 = vpack.c.bf16 %v46_v28, %v45_v27  ;;  %879 = vset.pattern.permute.xlu0 %v916_v37  ;;  %v689_v39 = vld [vmem:[%s1229_s2] ss:$0 sm:$0xff]  ;;  %v918_v61 = vmov 2475754826  }
  0x1c   :  { %848 = vmatprep.subr.bf16.mxu1 %v847_v19  ;;  %v853_v33 = vpack.c.bf16 %v78_v31, %v77_v30  ;;  %v29_v35 = vld [vmem:[%s1227_s0 + $0x10] sm:$0xff]  ;;  %v919_v0 = vmov 2131351028   ;;  %v920_v3 = vmov 2102212464   ;;  %s681_s8 = sshll.u32 %s928_s30, 4  ;;  %s682_s8 = int_to_ptr.vmem [resolvable:$true] %s681_s8 }
  0x1d   :  { %818 = vmatpush3.bf16.msra.mxu0 %v817_v24  ;;  %v921_v6 = vmov 920167782   ;;  %v922_v9 = vmov 1326507024   ;;  %s891_s9 = scalar_lea.vmem %s682_s8, 128  ;;  %p896_p1 = scmp.lt.s32.totalorder %s682_s8, %s682_s8 }
  0x1e   :  { %820 = vmatprep.subr.bf16.mxu0 %v819_v26  ;;  %p892_p0 = scmp.ne.s32.totalorder %s682_s8, %s891_s9  ;;  %p897_p2 = scmp.lt.s32.totalorder %s891_s9, %s891_s9 }
  0x1f   :  { %850 = vmatpush3.bf16.msra.mxu1 %v849_v25 }
  0x20   :  { %852 = vmatprep.subr.bf16.mxu1 %v851_v29  ;;  %p898_p3 = por %p897_p2, %p896_p1 }
  0x21   :  { %822 = vmatpush3.bf16.msra.mxu0 %v821_v32 }
  0x22   :  { %p899_p4 = pnand %p898_p3, %p892_p0 }
  0x23   :  { %854 = vmatpush3.bf16.msra.mxu1 %v853_v33 }
  0x24   :  { %167 = vmatmul.mubr.f32.vlgmr.msra.gmra.mrb[0].mxu0 %v27_v34 }
  0x26   :  { %237 = vmatmul.mubr.f32.vlgmr.msra.gmra.mrb[0].mxu1 %v29_v35 }
  0xf7   :  { %v733_v38 = vpop.f32.mrb[0].mxu0 }
  0xf8   :  { %v734_v40 = vpop.f32.mrb[1].mxu0 }
  0xf9   :  { %v768_v41 = vpop.f32.mrb[0].mxu1  ;;  %v735_v42 = vadd.f32 %v734_v40, %v733_v38 }
  0xfa   :  { %v769_v43 = vpop.f32.mrb[1].mxu1 }
  0xfb   :  { %v770_v44 = vadd.f32 %v769_v43, %v768_v41  ;;  %v169_v45 = vadd.f32 %v735_v42, %v689_v39 }
  0xfd   :  { %v239_v46 = vadd.f32 %v770_v44, %v169_v45 }
  0xff   :  { %885 = vtanh.f32 %v239_v46 }
 0x109   :  { %v886_v47 = vpop.eup %885 }
 0x10a   :  { %v1176_v48 = vmul.f32 0.7853982, %v886_v47 }
 0x10c   :  { %v247_v49 = vand.u32 2139095040, %v1176_v48  ;;  %v244_v53 = vand.u32 2147483647, %v1176_v48  ;;  %vm246_vm7 = vcmp.lt.s32.totalorder %v1176_v48, 0  ;;  %vm336_vm15 = vweird.f32 %v1176_v48 }
 0x10e   :  { %v248_v50 = vshrl.u32 %v247_v49, 23  ;;  %v251_v57 = vand.u32 8388607, %v244_v53  ;;  %vm245_vm8 = vcmp.le.f32.partialorder %v244_v53, 0.7853982 }
 0x110   :  { %v690_v51 = vadd.s32 4294967169, %v248_v50  ;;  %v252_v11 = vor.u32 8388608, %v251_v57 }
 0x112   :  { %v254_v52 = vadd.s32 1, %v690_v51  ;;  %v292_v25 = vshll.u32 %v252_v11, 8 }
 0x114   :  { %vm255_vm0 = vcmp.gt.s32.totalorder %v254_v52, 0 }
 0x115   :  { %v256_v54 = vsel %vm255_vm0, %v254_v52, 0  ;;  %vm926_vm0 = vmmov 0  }
 0x116   :  { %v258_v55 = vand.u32 31, %v256_v54  ;;  %v257_v58 = vshrl.u32 %v256_v54, 5 }
 0x118   :  { %v259_v56 = vsub.s32 32, %v258_v55  ;;  %v261_v60 = vshll.u32 %v917_v59, %v258_v55  ;;  %v264_v62 = vshll.u32 %v918_v61, %v258_v55  ;;  %v267_v2 = vshll.u32 %v919_v0, %v258_v55 }
 0x119   :  { %v270_v5 = vshll.u32 %v920_v3, %v258_v55  ;;  %v273_v8 = vshll.u32 %v921_v6, %v258_v55  ;;  %vm276_vm1 = vcmp.lt.s32.totalorder %v257_v58, 1  ;;  %vm279_vm2 = vcmp.lt.s32.totalorder %v257_v58, 4 }
 0x11a   :  { %v262_v63 = vshrl.u32 %v918_v61, %v259_v56  ;;  %v265_v1 = vshrl.u32 %v919_v0, %v259_v56  ;;  %v268_v4 = vshrl.u32 %v920_v3, %v259_v56  ;;  %v271_v7 = vshrl.u32 %v921_v6, %v259_v56 }
 0x11b   :  { %v274_v10 = vshrl.u32 %v922_v9, %v259_v56  ;;  %v260_v20 = vshrl.u32 %v917_v59, %v259_v56  ;;  %vm278_vm3 = vcmp.lt.s32.totalorder %v257_v58, 3  ;;  %vm277_vm4 = vcmp.lt.s32.totalorder %v257_v58, 2 }
 0x11c   :  { %v263_v12 = vor.u32 %v262_v63, %v261_v60  ;;  %v266_v13 = vor.u32 %v265_v1, %v264_v62  ;;  %v269_v14 = vor.u32 %v268_v4, %v267_v2  ;;  %v272_v15 = vor.u32 %v271_v7, %v270_v5 }
 0x11d   :  { %v275_v16 = vor.u32 %v274_v10, %v273_v8 }
 0x11e   :  { %v281_v17 = vsel %vm279_vm2, %v269_v14, 2102212464  ;;  %v284_v18 = vsel %vm276_vm1, %v263_v12, %v266_v13  ;;  %v288_v19 = vsel %vm276_vm1, %v266_v13, %v269_v14  ;;  %v285_v21 = vsel %vm279_vm2, %v272_v15, 920167782 }
 0x11f   :  { %v289_v22 = vsel %vm279_vm2, %v275_v16, 1326507024  ;;  %v286_v23 = vsel %vm278_vm3, %v269_v14, %v285_v21  ;;  %v280_v26 = vsel %vm276_vm1, %v260_v20, %v263_v12  ;;  %v282_v27 = vsel %vm278_vm3, %v266_v13, %v281_v17  ;;  %v515_v20 = vld [vmem:[%s1231_s4 + $0x8] sm:$0xff] }
 0x120   :  { %v290_v24 = vsel %vm278_vm3, %v272_v15, %v289_v22  ;;  %v287_v28 = vsel %vm277_vm4, %v284_v18, %v286_v23  ;;  %v283_v34 = vsel %vm277_vm4, %v280_v26, %v282_v27  ;;  %v923_v18 = vmov 2  }
 0x121   :  { %v291_v29 = vsel %vm277_vm4, %v288_v19, %v290_v24  ;;  %v1185_v32 = vmul.u32.u64.low %v292_v25, %v287_v28  ;;  %v1186_v33 = vmul.u32.u64.high %v292_v25, %v287_v28, %v1185_v32  ;;  %v299_v36 = vmul.u32 %v292_v25, %v283_v34  ;;  %v591_v24 = vld [vmem:[%s1232_s5] sm:$0xff] }
 0x122   :  { %v1182_v30 = vmul.u32.u64.low %v292_v25, %v291_v29  ;;  %v1183_v31 = vmul.u32.u64.high %v292_v25, %v291_v29, %v1182_v30  ;;  %v924_v19 = vmov 3   ;;  %v925_v22 = vmov 0.0|0.0   ;;  %v592_v25 = vld [vmem:[%s1232_s5 + $0x8] sm:$0xff] }
 0x123   :  { %v302_v35 = vadd.s32 1, %v1186_v33  ;;  %855 = vmatprep.subr.bf16.mxu0 %v925_v22  ;;  %858 = vmatprep.subr.bf16.mxu1 %v925_v22  ;;  %v927_v23 = vmov 0.0   ;;  %v859_v26 = vpack.c.bf16 %v592_v25, %v591_v24  ;;  %v457_v27 = vlaneseq  ;;  %v451_v30 = vld [vmem:[%s1230_s3] sm:$0xf] }
 0x124   :  { %vm301_vm5 = vc.u32 %v1183_v31, %v1185_v32  ;;  %v300_v49 = vadd.s32 %v1185_v32, %v1183_v31  ;;  %781 = vmatprep.mubr.msk.f32.mxu0 %vm926_vm0, %v927_v23  ;;  %788 = vmatprep.mubr.msk.f32.mxu1 %vm926_vm0, %v927_v23  ;;  %vm516_vm1 = vcmask 130048   ;;  %vm673_vm2 = vcmask 39936  }
 0x125   :  { %v303_v37 = vsel %vm301_vm5, %v302_v35, %v1186_v33  ;;  %860 = vmatpush3.bf16.msra.mxu1 %v859_v26  ;;  %v458_v28 = vshrl.u32 %v457_v27, 7 }
 0x126   :  { %v304_v38 = vadd.s32 %v303_v37, %v299_v36 }
 0x127   :  { %v459_v29 = vsub.s32 0, %v458_v28  ;;  %v490_v34 = vsub.s32 2, %v458_v28  ;;  %v475_v35 = vsub.s32 1, %v458_v28 }
 0x128   :  { %v305_v39 = vadd.s32 536870912, %v304_v38 }
 0x129   :  { %v460_v33 = vrot.slane %v451_v30, %v459_v29 }
 0x12a   :  { %v306_v40 = vshrl.u32 %v305_v39, 30  ;;  %v491_v39 = vrot.slane %v451_v30, %v490_v34 }
 0x12c   :  { %v307_v41 = vshll.u32 %v306_v40, 30  ;;  %v330_v62 = vsub.s32 4, %v306_v40 }
 0x12e   :  { %v308_v42 = vsub.s32 %v304_v38, %v307_v41  ;;  %v331_v1 = vsel %vm246_vm7, %v330_v62, %v306_v40  ;;  %v476_v40 = vrot.slane %v451_v30, %v475_v35 }
 0x12f   :  { %v333_v3 = vsel %vm245_vm8, 0, %v331_v1 }
 0x130   :  { %v310_v43 = vsub.s32 0, %v308_v42  ;;  %v440_v4 = vadd.s32 3, %v333_v3  ;;  %v337_v6 = vand.u32 3, %v333_v3 }
 0x132   :  { %v691_v44 = vmin.u32 %v310_v43, %v308_v42  ;;  %v441_v5 = vand.u32 3, %v440_v4  ;;  %vm342_vm10 = vcmp.eq.s32.totalorder %v337_v6, 2  ;;  %vm339_vm12 = vcmp.eq.s32.totalorder %v337_v6, 0 }
 0x133   :  { %vm338_vm14 = vcmp.lt.s32.totalorder %v337_v6, 2 }
 0x134   :  { %v312_v45 = vclz %v691_v44  ;;  %vm446_vm9 = vcmp.eq.s32.totalorder %v441_v5, 2  ;;  %vm443_vm11 = vcmp.eq.s32.totalorder %v441_v5, 0  ;;  %vm442_vm13 = vcmp.lt.s32.totalorder %v441_v5, 2 }
 0x136   :  { %v692_v46 = vadd.s32 4294967294, %v312_v45 }
 0x138   :  { %vm693_vm6 = vcmp.lt.s32.totalorder %v692_v46, 0 }
 0x139   :  { %v315_v47 = vsel %vm693_vm6, 0, %v692_v46 }
 0x13a   :  { %v316_v50 = vsub.s32 32, %v315_v47  ;;  %v320_v51 = vsub.s32 4294967266, %v315_v47  ;;  %v317_v52 = vshll.u32 %v308_v42, %v315_v47  ;;  %v505_v42 = vsub.s32 3, %v458_v28 }
 0x13c   :  { %v318_v54 = vshrl.u32 %v300_v49, %v316_v50  ;;  %v321_v55 = vadd.s32 127, %v320_v51  ;;  %v506_v49 = vrot.slane %v451_v30, %v505_v42 }
 0x13e   :  { %v319_v56 = vor.u32 %v318_v54, %v317_v52  ;;  %v322_v57 = vshll.u32 %v321_v55, 23 }
 0x140   :  { %v323_v58 = vor.u32 4788187, %v322_v57  ;;  %v326_v60 = vcvt.s32.f32 %v319_v56 }
 0x142   :  { %v324_v59 = vand.u32 2147483647, %v323_v58 }
 0x144   :  { %v327_v61 = vmul.f32 %v326_v60, %v324_v59 }
 0x146   :  { %v328_v63 = vxor.u32 2147483648, %v327_v61 }
 0x148   :  { %v329_v0 = vsel %vm246_vm7, %v328_v63, %v327_v61  ;;  %v699_v63 = vld [vmem:[%s1233_s6] ss:$0 sm:$0xff] }
 0x149   :  { %v332_v2 = vsel %vm245_vm8, %v1176_v48, %v329_v0  ;;  %v514_v48 = vld [vmem:[%s1231_s4] sm:$0xff] }
 0x14a   :  { %887 = vcosq.f32 %v332_v2  ;;  %v856_v21 = vpack.c.bf16 %v515_v20, %v514_v48 }
 0x14b   :  { %889 = vsinq.f32 %v332_v2 }
 0x14c   :  { %857 = vmatpush3.bf16.msra.mxu0 %v856_v21 }
 0x154   :  { %v888_v7 = vpop.eup %887 }
 0x155   :  { %v890_v8 = vpop.eup %889  ;;  %v343_v9 = vxor.u32 2147483648, %v888_v7 }
 0x156   :  { %v340_v10 = vxor.u32 2147483648, %v890_v8 }
 0x157   :  { %v448_v11 = vsel %vm446_vm9, %v343_v9, %v890_v8  ;;  %v344_v53 = vsel %vm342_vm10, %v343_v9, %v890_v8 }
 0x158   :  { %v445_v12 = vsel %vm443_vm11, %v888_v7, %v340_v10  ;;  %v341_v13 = vsel %vm339_vm12, %v888_v7, %v340_v10 }
 0x159   :  { %v449_v14 = vsel %vm442_vm13, %v445_v12, %v448_v11  ;;  %v345_v15 = vsel %vm338_vm14, %v341_v13, %v344_v53 }
 0x15a   :  { %v450_v16 = vsel %vm336_vm15, nan, %v449_v14  ;;  %v346_v17 = vsel %vm336_vm15, nan, %v345_v15 }
 0x15b   :  { %470 = vperm.xlu1 %880, %v450_v16   ;;  %454 = vperm.xlu0 %879, %v450_v16  }
 0x15f   :  { %479 = vperm.xlu1 %880, %v346_v17   ;;  %464 = vperm.xlu0 %879, %v346_v17  }
 0x163   :  { %882 = vset.pattern.permute.xlu1 %v923_v18  ;;  %881 = vset.pattern.permute.xlu0 %v923_v18 }
 0x164   :  { %494 = vperm.xlu1 %882, %v346_v17   ;;  %485 = vperm.xlu0 %881, %v450_v16  }
 0x168   :  { %883 = vset.pattern.permute.xlu1 %v924_v19  ;;  %884 = vset.pattern.permute.xlu0 %v924_v19 }
 0x169   :  { %500 = vperm.xlu1 %883, %v450_v16   ;;  %509 = vperm.xlu0 %884, %v346_v17  }
 0x1da   :  { %v471_v31 = vpop.permute.xlu1 %470  ;;  %v455_v32 = vpop.permute.xlu0 %454 }
 0x1db   :  { %v461_v38 = vmul.f32 %v460_v33, %v455_v32  ;;  %v477_v46 = vmul.f32 %v476_v40, %v471_v31 }
 0x1de   :  { %v480_v36 = vpop.permute.xlu1 %479  ;;  %v465_v37 = vpop.permute.xlu0 %464 }
 0x1df   :  { %v467_v41 = vadd.f32 %v465_v37, %v461_v38  ;;  %v482_v50 = vadd.f32 %v480_v36, %v477_v46 }
 0x1e1   :  { %v468_v47 = vmul.f32 0.25, %v467_v41 }
 0x1e3   :  { %v495_v43 = vpop.permute.xlu1 %494  ;;  %v486_v44 = vpop.permute.xlu0 %485  ;;  %v483_v54 = vmul.f32 %v482_v50, %v468_v47 }
 0x1e4   :  { %v492_v45 = vmul.f32 %v491_v39, %v486_v44 }
 0x1e6   :  { %v497_v51 = vadd.f32 %v495_v43, %v492_v45 }
 0x1e8   :  { %v501_v52 = vpop.permute.xlu1 %500  ;;  %v510_v56 = vpop.permute.xlu0 %509  ;;  %v498_v57 = vmul.f32 %v497_v51, %v483_v54 }
 0x1e9   :  { %v507_v55 = vmul.f32 %v506_v49, %v501_v52 }
 0x1eb   :  { %v512_v58 = vadd.f32 %v510_v56, %v507_v55 }
 0x1ed   :  { %v513_v59 = vmul.f32 %v512_v58, %v498_v57 }
 0x1ef   :  { %782 = vmatmul.mubr.msk.f32.vlgmr.msra.gmra.mrb[2].mxu0 %vm516_vm1, %v513_v59 }
 0x2c2   :  { %v586_v60 = vpop.f32.mrb[2].mxu0 }
 0x2c3   :  { %v590_v61 = vmul.f32 %v586_v60, %v586_v60  ;;  %v783_v62 = vpop.f32.mrb[3].mxu0 }
 0x2c5   :  { %789 = vmatmul.mubr.msk.f32.vlgmr.msra.gmra.mrb[2].mxu1 %vm516_vm1, %v590_v61 }
 0x398   :  { %v669_v0 = vpop.f32.mrb[2].mxu1 }
 0x399   :  { %v670_v1 = vadd.f32 %v699_v63, %v669_v0  ;;  %v790_v2 = vpop.f32.mrb[3].mxu1 }
 0x39b   :  { %674 = vst.msk [vmem:[#allocation2] sm:$0xff] %vm673_vm2, %v670_v1 }
 0x39c   :  { %902 = shalt.err (!%p899_p4)
}
 0x39d   :  { %s903_s12 = scalar_lea.hbm %s1234_s7, 128 }
 0x39e   :  { %p904_p5 = scmp.ne.s32.totalorder %s1234_s7, %s903_s12  ;;  %p907_p6 = scmp.lt.u32.totalorder %s903_s12, %s1234_s7 }
 0x3a0   :  { %p909_p7 = pnand %p907_p6, %p904_p5 }
 0x3a2   :  { %912 = shalt.err (!%p909_p7)
}
 0x3a3   :  { %684 = dma.vmem_to_hbm [thread:$0]  %s682_s8, 128, %s1234_s7, [#allocation3]  }
 0x3a4   :  { %913 = dma.done.wait [#allocation3], 128  }
 0x3a5   :  { %914 = vsyncadd [#allocation3], 4294967168 }
 0x3a6   :  { %688 = vsyncpa [#allocation3], 1 }

</bundles_post_ra>
